<compile_context>
chip_gen: v6e
topology: v6e:2x2x1
jax: 0.10.0
libtpu: 0.0.40
codegen_flags: <defaults>
</compile_context>

<pallas_src>
import jax
import jax.numpy as jnp
from jax.experimental import pallas as pl
from jax.experimental.pallas import tpu as pltpu


def _identity_kernel(x_ref, o_ref):
    # Pass-through of the current lane-dense (rows_tile, cols) block.
    o_ref[...] = x_ref[...]


# Lane-dense layout parameters.
_LANE = 128                    # vreg lane count — last dim kept a multiple of this.
_MAX_COLS = 1024               # cap on column width of the flattened 2-D view.
_TARGET_BLOCK_BYTES = 2 << 20  # ~2 MiB per block -> <= ~8 MiB with in+out double
                               # buffering: fits v5e's 16 MiB default scoped VMEM
                               # and v7x's 32 MiB scoped / 64 MiB physical VMEM
                               # with ample headroom (no vmem_limit override needed).


def sentence_encoder_forward(x):
    """Forward pass of the (abstract) SentenceEncoder as a Pallas TPU kernel.

    The base class defines no transform, so this is the identity contract,
    implemented as a lane-dense tiled copy with output aliased to the input.
    """
    orig_shape = x.shape
    n = x.size
    if n == 0:
        return x

    flat = x.reshape(-1)

    # Pick the widest lane-dense column count (multiple of 128, capped) that
    # divides the total element count.
    cols = 0
    c = _MAX_COLS
    while c >= _LANE:
        if n % c == 0:
            cols = c
            break
        c -= _LANE

    if cols == 0:
        # Total size not divisible by 128: single full-array block.  The
        # (8,128) constraint is exempted when block dims equal the full array
        # dims.  (Fine for the small shapes this abstract module sees; padding
        # would reintroduce copies for no semantic gain.)
        rows, cols = 1, n
        tm = 1
    else:
        rows = n // cols
        itemsize = x.dtype.itemsize
        # Largest row tile (multiple of 32 sublanes — covers f32/bf16/int8
        # packing) under the per-block byte budget.
        tm = max(32, (_TARGET_BLOCK_BYTES // (cols * itemsize)) // 32 * 32)
        if tm >= rows:
            tm = rows  # single block along rows -> full-dim exemption applies

    x2d = flat.reshape(rows, cols)
    grid = (pl.cdiv(rows, tm),)

    out2d = pl.pallas_call(
        _identity_kernel,
        out_shape=jax.ShapeDtypeStruct((rows, cols), x.dtype),
        grid_spec=pltpu.PrefetchScalarGridSpec(
            num_scalar_prefetch=0,
            grid=grid,
            in_specs=[pl.BlockSpec((tm, cols), lambda i: (i, 0))],
            out_specs=pl.BlockSpec((tm, cols), lambda i: (i, 0)),
        ),
        # Output aliases the input buffer: the identity contract then needs no
        # extra HBM allocation and XLA may drop the round-trip entirely.
        input_output_aliases={0: 0},
        compiler_params=pltpu.CompilerParams(
            # Row-tile axis is fully independent -> shard across v7x's 2 TCs;
            # no-op on single-TC v5e/v6e.
            dimension_semantics=("parallel",),
        ),
    )(x2d)

    return out2d.reshape(orig_shape)


if __name__ == "__main__":
    key = jax.random.PRNGKey(0)

    fwd = jax.jit(sentence_encoder_forward)

    # 1) Small sentence-shaped input: batch=2, seq=8, hidden=32
    #    (flattens to a single lane-dense (1, 512) block).
    x = jax.random.normal(key, (2, 8, 32), dtype=jnp.float32)
    y = jax.block_until_ready(fwd(x))
    assert y.shape == x.shape and y.dtype == x.dtype
    assert bool(jnp.allclose(y, x))

    # 2) Shape whose size is not a multiple of 128 -> full-array fallback block.
    x2 = jax.random.normal(jax.random.PRNGKey(1), (3, 7, 33), dtype=jnp.float32)
    y2 = jax.block_until_ready(fwd(x2))
    assert y2.shape == x2.shape and bool(jnp.allclose(y2, x2))

    # 3) Larger input exercising the multi-step row-tiled grid
    #    (flattens to (1024, 1024) -> two (512, 1024) ~2 MiB blocks).
    x3 = jax.random.normal(jax.random.PRNGKey(2), (8, 256, 512), dtype=jnp.float32)
    y3 = jax.block_until_ready(fwd(x3))
    assert y3.shape == x3.shape and bool(jnp.allclose(y3, x3))

    print("KERNEL_OK")
</pallas_src>

<mosaic_0001>
module attributes {stable_mosaic.version = 11 : i64} {
  func.func @_identity_kernel(%arg0: i32, %arg1: memref<1x512xf32, #tpu.memory_space<vmem>>, %arg2: memref<1x512xf32, #tpu.memory_space<vmem>>) attributes {dimension_semantics = [#tpu.dimension_semantics<parallel>], iteration_bounds = array<i64: 1>, scalar_prefetch = 0 : i64, scratch_operands = 0 : i64, tpu.core_type = #tpu.core_type<tc>, window_params = [{transform_indices = @transform_0, window_bounds = array<i64: 1, 512>}, {transform_indices = @transform_1, window_bounds = array<i64: 1, 512>}]} {
    %c0 = arith.constant 0 : index
    %c0_0 = arith.constant 0 : index
    %0 = vector.load %arg1[%c0, %c0_0] : memref<1x512xf32, #tpu.memory_space<vmem>>, vector<1x512xf32>
    %c0_1 = arith.constant 0 : index
    %c0_2 = arith.constant 0 : index
    %1 = vector.load %arg2[%c0_1, %c0_2] : memref<1x512xf32, #tpu.memory_space<vmem>>, vector<1x512xf32>
    tpu.vector_store %arg2[%c0_1, %c0_2], %0 {strides = array<i32>} : memref<1x512xf32, #tpu.memory_space<vmem>>, vector<1x512xf32>,
    return
  }
  func.func @transform_0(%arg0: i32) -> (i32, i32) {
    %c0_i32 = arith.constant 0 : i32
    %c0_i32_0 = arith.constant 0 : i32
    return %arg0, %c0_i32 : i32, i32
  }
  func.func @transform_1(%arg0: i32) -> (i32, i32) {
    %c0_i32 = arith.constant 0 : i32
    %c0_i32_0 = arith.constant 0 : i32
    return %arg0, %c0_i32 : i32, i32
  }
}

</mosaic_0001>

<bundles_post_ra>
// kernel: sentence_encoder_forward.1
= control target key start
LH: loop header
LB: loop body
LE: loop exit
PB: predicated region body
PF: predicated region fallthrough
CT: control target
= control target key end

     0   :  { %v9_v0 = vlaneseq  ;;  %s34_s0 = inlined_call_operand.vmem [shape: f32[1,512], index: 0, kind: input, shape index: {}, may-alias: {0,1}]   ;;  %s35_s1 = inlined_call_operand.vmem [shape: f32[1,512], index: 1, kind: output, shape index: {}, may-alias: {0,1}]  }
   0x1   :  { %v8_v1 = vld [vmem:[%s34_s0] sm:$0xf] }
   0x2   :  { %vm11_vm0 = vcmp.lt.s32.totalorder %v9_v0, 512 }
   0x3   :  { %13 = vst.msk [vmem:[%s35_s1] sm:$0xf] %vm11_vm0, %v8_v1 }

</bundles_post_ra>
